<compile_context>
chip_gen: v6e
topology: v6e:2x2x1
jax: 0.10.0
libtpu: 0.0.40
codegen_flags: <defaults>
</compile_context>

<pallas_src>
import functools

import jax
import jax.numpy as jnp
from jax.experimental import pallas as pl
from jax.experimental.pallas import tpu as pltpu


# ---------------------------------------------------------------------------
# Kernel
# ---------------------------------------------------------------------------
def channel_attention_kernel(x_ref, w1t_ref, w2t_ref, o_ref, acc_ref, *, hw, rem):
    """Grid: (B // Bt, nk).

    x_ref:   (Bt, C, hw_tile)   spatial tile of the input
    w1t_ref: (C, Cr)            first 1x1-conv weight, pre-transposed
    w2t_ref: (Cr, C)            second 1x1-conv weight, pre-transposed
    o_ref:   (Bt, 1, C)         sigmoid(se(max) + se(avg)) per channel
    acc_ref: (2, Bt, C) f32     row 0 = running max, row 1 = running sum
    hw:      static total spatial extent H*W
    rem:     static number of valid lanes in the last spatial tile
    """
    k = pl.program_id(1)
    nk = pl.num_programs(1)
    hw_tile = x_ref.shape[-1]

    @pl.when(k == 0)
    def _init():
        acc_ref[0] = jnp.full(acc_ref.shape[1:], -jnp.inf, acc_ref.dtype)
        acc_ref[1] = jnp.zeros(acc_ref.shape[1:], acc_ref.dtype)

    def accumulate(valid):
        x = x_ref[...].astype(jnp.float32)                   # (Bt, C, hw_tile)
        if valid < hw_tile:
            # Only the last (ragged) tile pays for the mask; the padded block
            # region holds unspecified data, so mask every lane >= valid.
            lane = jax.lax.broadcasted_iota(jnp.int32, x.shape, 2)
            ok = lane < valid
            x_max = jnp.where(ok, x, -jnp.inf)
            x_sum = jnp.where(ok, x, 0.0)
        else:
            x_max = x
            x_sum = x
        acc_ref[0] = jnp.maximum(acc_ref[0], jnp.max(x_max, axis=-1))   # (Bt, C)
        acc_ref[1] = acc_ref[1] + jnp.sum(x_sum, axis=-1)               # (Bt, C)

    if rem == hw_tile:
        # No ragged tail: every tile (including the last) is unmasked.
        accumulate(hw_tile)
    else:
        @pl.when(k < nk - 1)
        def _steady():
            accumulate(hw_tile)

        @pl.when(k == nk - 1)
        def _tail():
            accumulate(rem)

    @pl.when(k == nk - 1)
    def _finalize():
        max_p = acc_ref[0]                                   # (Bt, C)
        avg_p = acc_ref[1] * (1.0 / hw)                      # (Bt, C), mean once
        # Fuse the two SE branches into one matmul pair on a (2*Bt, C) operand.
        p = jnp.concatenate([max_p, avg_p], axis=0)          # (2*Bt, C)
        h = jnp.dot(p, w1t_ref[...], preferred_element_type=jnp.float32)
        h = jnp.maximum(h, 0.0)                              # ReLU
        y = jnp.dot(h, w2t_ref[...], preferred_element_type=jnp.float32)
        bt = max_p.shape[0]
        out = jax.nn.sigmoid(y[:bt, :] + y[bt:, :])          # (Bt, C)
        o_ref[...] = out.reshape(o_ref.shape).astype(o_ref.dtype)


# ---------------------------------------------------------------------------
# Tiling / VMEM planning
# ---------------------------------------------------------------------------
def _vmem_capacity_bytes():
    try:
        return int(pltpu.get_tpu_info().vmem_capacity_bytes)
    except Exception:
        return 64 << 20          # conservative fallback: assume v7x-sized VMEM


def _plan_blocks(B, C, HW, itemsize, budget, hw_tile, batch_tile):
    """Pick (batch_tile Bt, spatial tile) under a per-buffer VMEM budget."""
    row_bytes = C * HW * itemsize

    if hw_tile is not None:
        # Correctness guard: a sub-extent spatial tile must be a multiple of
        # 128 lanes (BlockSpec (8,128) rule); full extent is always legal.
        tile = HW if hw_tile >= HW else max(128, (hw_tile // 128) * 128)
    elif row_bytes <= budget or HW <= 256:
        tile = HW                                     # whole row in one block
    else:
        # Stream the spatial axis in multi-MiB, lane-aligned tiles.
        hw_floor = (HW // 128) * 128
        t = (budget // (C * itemsize)) // 128 * 128
        tile = max(128, min(t, hw_floor))

    if batch_tile is not None:
        bt = max(1, min(int(batch_tile), B))
    elif tile == HW and row_bytes <= budget:
        # Small rows: block over batch to amortize per-grid-step overhead, but
        # keep >= 2 outer ("parallel") steps so both v7x TensorCores get work.
        bt_cap = max(1, B // 2) if B >= 2 else 1
        bt = min(max(1, budget // max(row_bytes, 1)), bt_cap, B)
    else:
        bt = 1
    while B % bt:                                     # keep blocks exact
        bt -= 1
    return bt, tile


# ---------------------------------------------------------------------------
# Wrapper
# ---------------------------------------------------------------------------
def channel_attention(x, w1, w2, *, hw_tile=None, batch_tile=None):
    """x: (B, C, H, W) NCHW; w1: (C//r, C); w2: (C, C//r). Returns (B, C, 1, 1)."""
    B, C, H, W = x.shape
    HW = H * W
    Cr = w1.shape[0]
    itemsize = x.dtype.itemsize

    cap = _vmem_capacity_bytes()
    # Generation-aware per-buffer DMA budget: ~1/8 of physical VMEM so the
    # double-buffered x stream uses ~1/4 of it (v5e/v6e 128 MiB -> 16 MiB per
    # buffer, v7x 64 MiB -> 8 MiB per buffer).
    budget = int(min(max(cap // 8, 4 << 20), 16 << 20))

    bt, tile = _plan_blocks(B, C, HW, itemsize, budget, hw_tile, batch_tile)
    nk = pl.cdiv(HW, tile)
    rem = HW - (nk - 1) * tile          # valid lanes in the last spatial tile

    x3 = x.reshape(B, C, HW)
    # Pre-transpose the 1x1-conv weights once outside the kernel.
    w1t = jnp.transpose(w1).astype(jnp.float32)      # (C, Cr)
    w2t = jnp.transpose(w2).astype(jnp.float32)      # (Cr, C)

    kernel = functools.partial(channel_attention_kernel, hw=HW, rem=rem)

    # Explicit scoped-VMEM limit sized from the actual double-buffered blocks
    # (+25% headroom + Mosaic internal scratch), never above 3/4 of physical.
    x_buf = bt * C * tile * itemsize
    est = 2 * (x_buf + 2 * C * Cr * 4 + bt * C * itemsize) + 2 * bt * C * 4
    vmem_limit = int(min(max(int(est * 1.25) + (4 << 20), 32 << 20),
                         int(cap * 0.75)))

    cost = pl.CostEstimate(
        flops=int(2 * B * C * HW + 8 * B * C * Cr),
        transcendentals=int(B * C),
        bytes_accessed=int(B * C * HW * itemsize + 2 * C * Cr * 4
                           + B * C * itemsize),
    )

    out3 = pl.pallas_call(
        kernel,
        out_shape=jax.ShapeDtypeStruct((B, 1, C), x.dtype),
        grid_spec=pltpu.PrefetchScalarGridSpec(
            num_scalar_prefetch=0,
            grid=(B // bt, nk),
            in_specs=[
                pl.BlockSpec((bt, C, tile), lambda b, k: (b, 0, k)),
                pl.BlockSpec((C, Cr), lambda b, k: (0, 0)),
                pl.BlockSpec((Cr, C), lambda b, k: (0, 0)),
            ],
            out_specs=pl.BlockSpec((bt, 1, C), lambda b, k: (b, 0, 0)),
            scratch_shapes=[
                pltpu.VMEM((2, bt, C), jnp.float32),   # [0]=running max, [1]=running sum
            ],
        ),
        compiler_params=pltpu.CompilerParams(
            dimension_semantics=("parallel", "arbitrary"),
            vmem_limit_bytes=vmem_limit),
        cost_estimate=cost,
    )(x3, w1t, w2t)

    return out3.reshape(B, C, 1, 1)


# ---------------------------------------------------------------------------
# Pure-JAX reference mirroring the PyTorch module
# ---------------------------------------------------------------------------
def channel_attention_ref(x, w1, w2):
    max_p = jnp.max(x, axis=(2, 3))                  # (B, C)
    avg_p = jnp.mean(x, axis=(2, 3))                 # (B, C)

    def se(p):
        return jnp.maximum(p @ w1.T, 0.0) @ w2.T

    return jax.nn.sigmoid(se(max_p) + se(avg_p))[:, :, None, None]


if __name__ == "__main__":
    reduction = 8

    def check(x, w1, w2, **kw):
        out = jax.block_until_ready(channel_attention(x, w1, w2, **kw))
        ref = channel_attention_ref(x, w1, w2)
        assert out.shape == ref.shape, (out.shape, ref.shape)
        assert jnp.allclose(out, ref, atol=1e-5, rtol=1e-5), "mismatch vs reference"

    key = jax.random.PRNGKey(0)
    kx, k1, k2, kx2, kx3 = jax.random.split(key, 5)

    B, C, H, W = 2, 32, 16, 16
    Cr = C // reduction

    x = jax.random.normal(kx, (B, C, H, W), dtype=jnp.float32)
    # Deterministic synthetic Conv2d(1x1, bias=False) weights (kaiming-ish scale).
    w1 = jax.random.normal(k1, (Cr, C), dtype=jnp.float32) * (1.0 / jnp.sqrt(C))
    w2 = jax.random.normal(k2, (C, Cr), dtype=jnp.float32) * (1.0 / jnp.sqrt(Cr))

    # 1) Auto plan: whole spatial row in one tile (nk == 1).
    check(x, w1, w2)

    # 2) Forced hw_tile=128 -> 2 spatial grid steps: exercises the running
    #    max/sum accumulator with pl.when init/finalize.
    check(x, w1, w2, hw_tile=128)

    # 3) Ragged spatial extent (HW=130 with hw_tile=128): exercises the
    #    masked-last-tile path (mask applied only on the final tile).
    x_rag = jax.random.normal(kx2, (B, C, 10, 13), dtype=jnp.float32)
    check(x_rag, w1, w2, hw_tile=128)

    # 4) Batch blocking: B=4 with small rows -> auto plan picks Bt=2
    #    (two "parallel" outer steps, whole row per block).
    x_b4 = jax.random.normal(kx3, (4, C, H, W), dtype=jnp.float32)
    check(x_b4, w1, w2)

    print("KERNEL_OK")
</pallas_src>

<mosaic_0001>
module attributes {stable_mosaic.version = 11 : i64} {
  func.func @channel_attention_kernel(%arg0: i32, %arg1: i32, %arg2: memref<1x32x256xf32, #tpu.memory_space<vmem>>, %arg3: memref<32x4xf32, #tpu.memory_space<vmem>>, %arg4: memref<4x32xf32, #tpu.memory_space<vmem>>, %arg5: memref<1x1x32xf32, #tpu.memory_space<vmem>>, %arg6: memref<2x1x32xf32, #tpu.memory_space<vmem>>) attributes {dimension_semantics = [#tpu.dimension_semantics<parallel>, #tpu.dimension_semantics<arbitrary>], iteration_bounds = array<i64: 2, 1>, scalar_prefetch = 0 : i64, scratch_operands = 1 : i64, tpu.core_type = #tpu.core_type<tc>, window_params = [{transform_indices = @transform_0, window_bounds = array<i64: 1, 32, 256>}, {pipeline_mode = #tpu.pipeline_mode<synchronous>, transform_indices = @transform_1, window_bounds = array<i64: 32, 4>}, {pipeline_mode = #tpu.pipeline_mode<synchronous>, transform_indices = @transform_2, window_bounds = array<i64: 4, 32>}, {transform_indices = @transform_3, window_bounds = array<i64: 1, 1, 32>}]} {
    %c0_i32 = arith.constant 0 : i32
    %0 = arith.cmpi eq, %arg1, %c0_i32 : i32
    %1 = arith.extui %0 : i1 to i32
    %c0_i32_0 = arith.constant 0 : i32
    %2 = arith.cmpi ne, %1, %c0_i32_0 : i32
    scf.if %2 {
      %cst_17 = arith.constant 0xFF800000 : f32
      %21 = vector.broadcast %cst_17 : f32 to vector<1x32xf32>
      %c0_18 = arith.constant 0 : index
      %c0_19 = arith.constant 0 : index
      %c0_20 = arith.constant 0 : index
      %22 = vector.load %arg6[%c0_18, %c0_19, %c0_20] : memref<2x1x32xf32, #tpu.memory_space<vmem>>, vector<1x1x32xf32>
      %23 = vector.shape_cast %22 : vector<1x1x32xf32> to vector<1x32xf32>
      %24 = vector.shape_cast %21 : vector<1x32xf32> to vector<1x1x32xf32>
      tpu.vector_store %arg6[%c0_18, %c0_19, %c0_20], %24 {strides = array<i32>} : memref<2x1x32xf32, #tpu.memory_space<vmem>>, vector<1x1x32xf32>,
      %cst_21 = arith.constant 0.000000e+00 : f32
      %25 = vector.broadcast %cst_21 : f32 to vector<1x32xf32>
      %c1_22 = arith.constant 1 : index
      %c0_23 = arith.constant 0 : index
      %c0_24 = arith.constant 0 : index
      %26 = vector.load %arg6[%c1_22, %c0_23, %c0_24] : memref<2x1x32xf32, #tpu.memory_space<vmem>>, vector<1x1x32xf32>
      %27 = vector.shape_cast %26 : vector<1x1x32xf32> to vector<1x32xf32>
      %28 = vector.shape_cast %25 : vector<1x32xf32> to vector<1x1x32xf32>
      tpu.vector_store %arg6[%c1_22, %c0_23, %c0_24], %28 {strides = array<i32>} : memref<2x1x32xf32, #tpu.memory_space<vmem>>, vector<1x1x32xf32>,
    } else {
    }
    %c0 = arith.constant 0 : index
    %c0_1 = arith.constant 0 : index
    %c0_2 = arith.constant 0 : index
    %3 = vector.load %arg2[%c0, %c0_1, %c0_2] : memref<1x32x256xf32, #tpu.memory_space<vmem>>, vector<1x32x256xf32>
    %c0_3 = arith.constant 0 : index
    %c0_4 = arith.constant 0 : index
    %c0_5 = arith.constant 0 : index
    %4 = vector.load %arg6[%c0_3, %c0_4, %c0_5] : memref<2x1x32xf32, #tpu.memory_space<vmem>>, vector<1x1x32xf32>
    %5 = vector.shape_cast %4 : vector<1x1x32xf32> to vector<1x32xf32>
    %cst = arith.constant dense<0xFF800000> : vector<1x32xf32>
    %6 = vector.multi_reduction <maximumf>, %3, %cst [2] : vector<1x32x256xf32> to vector<1x32xf32>
    %7 = arith.maximumf %5, %6 : vector<1x32xf32>
    %c0_6 = arith.constant 0 : index
    %c0_7 = arith.constant 0 : index
    %c0_8 = arith.constant 0 : index
    %8 = vector.load %arg6[%c0_6, %c0_7, %c0_8] : memref<2x1x32xf32, #tpu.memory_space<vmem>>, vector<1x1x32xf32>
    %9 = vector.shape_cast %8 : vector<1x1x32xf32> to vector<1x32xf32>
    %10 = vector.shape_cast %7 : vector<1x32xf32> to vector<1x1x32xf32>
    tpu.vector_store %arg6[%c0_6, %c0_7, %c0_8], %10 {strides = array<i32>} : memref<2x1x32xf32, #tpu.memory_space<vmem>>, vector<1x1x32xf32>,
    %c1 = arith.constant 1 : index
    %c0_9 = arith.constant 0 : index
    %c0_10 = arith.constant 0 : index
    %11 = vector.load %arg6[%c1, %c0_9, %c0_10] : memref<2x1x32xf32, #tpu.memory_space<vmem>>, vector<1x1x32xf32>
    %12 = vector.shape_cast %11 : vector<1x1x32xf32> to vector<1x32xf32>
    %cst_11 = arith.constant dense<0.000000e+00> : vector<1x32xf32>
    %13 = vector.multi_reduction <add>, %3, %cst_11 [2] : vector<1x32x256xf32> to vector<1x32xf32>
    %14 = arith.addf %12, %13 : vector<1x32xf32>
    %c1_12 = arith.constant 1 : index
    %c0_13 = arith.constant 0 : index
    %c0_14 = arith.constant 0 : index
    %15 = vector.load %arg6[%c1_12, %c0_13, %c0_14] : memref<2x1x32xf32, #tpu.memory_space<vmem>>, vector<1x1x32xf32>
    %16 = vector.shape_cast %15 : vector<1x1x32xf32> to vector<1x32xf32>
    %17 = vector.shape_cast %14 : vector<1x32xf32> to vector<1x1x32xf32>
    tpu.vector_store %arg6[%c1_12, %c0_13, %c0_14], %17 {strides = array<i32>} : memref<2x1x32xf32, #tpu.memory_space<vmem>>, vector<1x1x32xf32>,
    %c0_i32_15 = arith.constant 0 : i32
    %18 = arith.cmpi eq, %arg1, %c0_i32_15 : i32
    %19 = arith.extui %18 : i1 to i32
    %c0_i32_16 = arith.constant 0 : i32
    %20 = arith.cmpi ne, %19, %c0_i32_16 : i32
    scf.if %20 {
      %c0_17 = arith.constant 0 : index
      %c0_18 = arith.constant 0 : index
      %c0_19 = arith.constant 0 : index
      %21 = vector.load %arg6[%c0_17, %c0_18, %c0_19] : memref<2x1x32xf32, #tpu.memory_space<vmem>>, vector<1x1x32xf32>
      %22 = vector.shape_cast %21 : vector<1x1x32xf32> to vector<1x32xf32>
      %c1_20 = arith.constant 1 : index
      %c0_21 = arith.constant 0 : index
      %c0_22 = arith.constant 0 : index
      %23 = vector.load %arg6[%c1_20, %c0_21, %c0_22] : memref<2x1x32xf32, #tpu.memory_space<vmem>>, vector<1x1x32xf32>
      %24 = vector.shape_cast %23 : vector<1x1x32xf32> to vector<1x32xf32>
      %cst_23 = arith.constant 3.906250e-03 : f32
      %25 = vector.broadcast %cst_23 : f32 to vector<1x32xf32>
      %26 = arith.mulf %24, %25 : vector<1x32xf32>
      %27 = tpu.concatenate %22, %26 in 0 : vector<1x32xf32>, vector<1x32xf32> -> vector<2x32xf32>
      %c0_24 = arith.constant 0 : index
      %c0_25 = arith.constant 0 : index
      %28 = vector.load %arg3[%c0_24, %c0_25] : memref<32x4xf32, #tpu.memory_space<vmem>>, vector<32x4xf32>
      %cst_26 = arith.constant dense<0.000000e+00> : vector<2x4xf32>
      %29 = tpu.matmul %27, %28, %cst_26 {dimension_numbers = #tpu.dot_dimension_numbers<[1], [0], [0], [1], [0, 0, 1, 1], [], []>} : vector<2x32xf32>, vector<32x4xf32>, vector<2x4xf32> -> vector<2x4xf32>
      %cst_27 = arith.constant 0.000000e+00 : f32
      %30 = vector.broadcast %cst_27 : f32 to vector<2x4xf32>
      %31 = arith.maximumf %29, %30 : vector<2x4xf32>
      %c0_28 = arith.constant 0 : index
      %c0_29 = arith.constant 0 : index
      %32 = vector.load %arg4[%c0_28, %c0_29] : memref<4x32xf32, #tpu.memory_space<vmem>>, vector<4x32xf32>
      %cst_30 = arith.constant dense<0.000000e+00> : vector<2x32xf32>
      %33 = tpu.matmul %31, %32, %cst_30 {dimension_numbers = #tpu.dot_dimension_numbers<[1], [0], [0], [1], [0, 0, 1, 1], [], []>} : vector<2x4xf32>, vector<4x32xf32>, vector<2x32xf32> -> vector<2x32xf32>
      %34 = vector.extract_strided_slice %33 {offsets = [0, 0], sizes = [1, 32], strides = [1, 1]} : vector<2x32xf32> to vector<1x32xf32>
      %35 = vector.extract_strided_slice %33 {offsets = [1, 0], sizes = [1, 32], strides = [1, 1]} : vector<2x32xf32> to vector<1x32xf32>
      %36 = arith.addf %34, %35 : vector<1x32xf32>
      %37 = arith.negf %36 : vector<1x32xf32>
      %38 = math.exp %37 : vector<1x32xf32>
      %cst_31 = arith.constant 1.000000e+00 : f32
      %39 = vector.broadcast %cst_31 : f32 to vector<1x32xf32>
      %40 = arith.addf %39, %38 : vector<1x32xf32>
      %41 = arith.divf %39, %40 : vector<1x32xf32>
      %42 = vector.shape_cast %41 : vector<1x32xf32> to vector<1x1x32xf32>
      %c0_32 = arith.constant 0 : index
      %c0_33 = arith.constant 0 : index
      %c0_34 = arith.constant 0 : index
      %43 = vector.load %arg5[%c0_32, %c0_33, %c0_34] : memref<1x1x32xf32, #tpu.memory_space<vmem>>, vector<1x1x32xf32>
      tpu.vector_store %arg5[%c0_32, %c0_33, %c0_34], %42 {strides = array<i32>} : memref<1x1x32xf32, #tpu.memory_space<vmem>>, vector<1x1x32xf32>,
    } else {
    }
    return
  }
  func.func @transform_0(%arg0: i32, %arg1: i32) -> (i32, i32, i32) {
    %c0_i32 = arith.constant 0 : i32
    %c0_i32_0 = arith.constant 0 : i32
    return %arg0, %c0_i32, %arg1 : i32, i32, i32
  }
  func.func @transform_1(%arg0: i32, %arg1: i32) -> (i32, i32) {
    %c0_i32 = arith.constant 0 : i32
    %c0_i32_0 = arith.constant 0 : i32
    %c0_i32_1 = arith.constant 0 : i32
    return %c0_i32, %c0_i32_0 : i32, i32
  }
  func.func @transform_2(%arg0: i32, %arg1: i32) -> (i32, i32) {
    %c0_i32 = arith.constant 0 : i32
    %c0_i32_0 = arith.constant 0 : i32
    %c0_i32_1 = arith.constant 0 : i32
    return %c0_i32, %c0_i32_0 : i32, i32
  }
  func.func @transform_3(%arg0: i32, %arg1: i32) -> (i32, i32, i32) {
    %c0_i32 = arith.constant 0 : i32
    %c0_i32_0 = arith.constant 0 : i32
    %c0_i32_1 = arith.constant 0 : i32
    return %arg0, %c0_i32, %c0_i32_0 : i32, i32, i32
  }
}

</mosaic_0001>

<bundles_post_ra>
// kernel: tpu_custom_call.1
= control target key start
LH: loop header
LB: loop body
LE: loop exit
PB: predicated region body
PF: predicated region fallthrough
CT: control target
= control target key end

     0   :  { %8 = vsyncpa [#allocation4], 0  ;;  %s1853_s0 = inlined_call_operand.hbm [shape: f32[2,32,256], index: 0, kind: input, shape index: {}]   ;;  %s1854_s1 = inlined_call_operand.vmem [shape: f32[32,4], index: 1, kind: input, shape index: {}]   ;;  %s1855_s2 = inlined_call_operand.vmem [shape: f32[4,32], index: 2, kind: input, shape index: {}]   ;;  %s1856_s3 = inlined_call_operand.hbm [shape: f32[2,1,32], index: 3, kind: output, shape index: {}]  }
   0x1   :  { %10 = vsyncpa [#allocation4 + $0x1], 0 }
   0x2   :  { %11 = vsyncpa [#allocation5], 0 }
   0x3   :  { %13 = vsyncpa [#allocation5 + $0x1], 0  ;;  %s1536_s12 = smov 0   ;;  %s1538_s13 = smov 0  }
   0x4   :  { %s1540_s14 = smov 0   ;;  %s1542_s15 = smov 0  }
   0x5   :  { %s1544_s16 = smov 0   ;;  %s1546_s17 = smov 0  }
   0x6 LB: > { %s1282_s18 = sadd.s32 4294967295, %s1505_s17   ;;  %s1283_s19 = sadd.s32 4294967294, %s1505_s17   ;;  %s1505_s17 = sphi %s1546_s17, %s19_s17   ;;  %s1501_s16 = sphi %s1544_s16, %s1867_s16   ;;  %s1497_s15 = sphi %s1542_s15, %s1866_s15   ;;  %s1493_s14 = sphi %s1540_s14, %s1865_s14   ;;  %s1489_s13 = sphi %s1538_s13, %s1864_s13   ;;  %s1485_s12 = sphi %s1536_s12, %s1863_s12  }
   0x7   : > { %s31_s20 = sadd.s32 1, %s1501_s16  ;;  %s40_s21 = sadd.s32 1, %s1493_s14 }
   0x8   : > { %p33_p0 = scmp.ge.s32.totalorder %s31_s20, 2  ;;  %p47_p1 = scmp.ne.s32.totalorder %s1493_s14, %s1489_s13 }
   0x9   : > { %p48_p2 = scmp.eq.s32.totalorder %s1505_s17, 0  ;;  %p53_p3 = scmp.ne.s32.totalorder %s1489_s13, %s1485_s12 }
   0xa   : > { %s1869_s20 = smov (%p33_p0, %s31_s20), 0  ;;  %p54_p5 = scmp.eq.s32.totalorder %s1282_s18, 0 }
   0xb   : > { %p1577_p4 = por %p48_p2, %p47_p1  ;;  %s35_s23 = ssub.s32 %s1501_s16, %s1869_s20 }
   0xc   : > { %p119_p6 = scmp.eq.s32.totalorder %s1282_s18, 1  ;;  %p38_p7 = scmp.eq.s32.totalorder %s35_s23, 0 }
   0xd   : > { %p1583_p8 = por %p54_p5, %p53_p3  ;;  %p125_p10 = scmp.eq.s32.totalorder %s1283_s19, 1 }
   0xe   : > { %p1587_p9 = por %p119_p6, %p47_p1  ;;  %p1334_p13 = scmp.lt.s32.totalorder %s1505_s17, 2 }
   0xf   : > { %s1592_s26 = scalar_select %p38_p7, %s1493_s14, %s40_s21  }
  0x10   : > { %p1594_p11 = por %p125_p10, %p53_p3  ;;  %s151_s28 = sand.u32 1, %s1493_s14  }
  0x11   : > { %s1286_s29 = sshll.u32 %s151_s28, 6  ;;  %s1298_s30 = sshll.u32 %s1501_s16, 10 }
  0x12   : > { %s163_s6 = scalar_lea.hbm %s1853_s0, %s1298_s30  ;;  %s155_s7 = scalar_lea.vmem [#allocation3], %s1286_s29 }
  0x13   : > { %s164_s8 = sshll.u32 %s155_s7, 4  ;;  %p1607_p0 = pnand %p1334_p13, %p1577_p4  ;;  %s165_s8 = int_to_ptr.vmem [resolvable:$true] %s164_s8 }
  0x14   : > { %p1289_p1 = scmp.ge.s32.totalorder %s1505_s17, 1  ;;  %s152_s10 = scalar_lea.sflag [#allocation4], %s151_s28 }
  0x15   : > { %p1399_p2 = pneg %p1607_p0  ;;  %s1410_s11 = scalar_lea.vmem %s165_s8, 1024 }
  0x16   : > { %p1411_p3 = scmp.ne.s32.totalorder %s165_s8, %s1410_s11  ;;  %s1507_s18 = smov [#allocation3]  }
  0x17   : > { %s1415_s19 = sshll.u32 %s1507_s18, 4  ;;  %s1416_s19 = int_to_ptr.vmem [resolvable:$false] %s1415_s19 }
  0x18   : > { %p1413_p5 = pnand %p1411_p3, %p1399_p2  ;;  %s1417_s21 = scalar_lea.vmem %s1416_s19, 2048 }
  0x19   : > { %p1418_p7 = scmp.lt.s32.totalorder %s165_s8, %s1416_s19  ;;  %p1419_p10 = scmp.lt.s32.totalorder %s1417_s21, %s1410_s11 }
  0x1a   : > { %p1414_p6 = pneg %p1413_p5 }
  0x1b   : > { %p1420_p12 = por %p1419_p10, %p1418_p7 }
  0x1d   : > { %p1421_p4 = pnand %p1420_p12, %p1414_p6 }
  0x1f   : > { %1424 = shalt.err (!%p1421_p4)
}
  0x20   : > { %s1508_s22 = smov 256   ;;  %s1509_s23 = smov 16  }
  0x21   : > { %1329 = dma.hbm_to_vmem [thread:$0]  (!%p1607_p0), %s163_s6, 1024, %s165_s8, %s152_s10, %s1508_s22, %s1508_s22, %s1509_s23  }
  0x22   : > { %p172_p13 = scmp.lt.s32.totalorder %s1505_s17, 3 }
  0x24   : > { %p173_p2 = pnand %p1289_p1, %p172_p13 }
  0x25   : > { %s1620_s28 = sand.u32 (!%p173_p2), 1, %s1489_s13  }
  0x26   : > { %176 = sbr.rel (%p173_p2) target bundleno = 813 (0x32d), region = 32  ;;  %s1290_s29 = sshll.u32 (!%p173_p2), %s1620_s28, 6 }
  0x27   : > { %s179_s30 = scalar_lea.sflag (!%p173_p2), [#allocation4], %s1620_s28  ;;  %s182_s4 = scalar_lea.vmem (!%p173_p2), [#allocation3], %s1290_s29 }
  0x2b   : > { %1476 = dma.done.wait (%p1583_p8), %s179_s30, 1024  }
  0x2c   : > { %1478 = vsyncadd (%p1583_p8), %s179_s30, 4294966272  ;;  %v213_v0 = vld [vmem:[%s182_s4] sm:$0xff]  ;;  %v214_v1 = vld [vmem:[%s182_s4 + $0x8] sm:$0xff]  ;;  %v1510_v16 = vmov 0   ;;  %v238_v17 = vlaneseq  ;;  %v1511_v18 = vmov 1966171168  }
  0x2d   : > { %v215_v2 = vld [vmem:[%s182_s4 + $0x10] sm:$0xff]  ;;  %v621_v3 = vadd.f32 %v214_v1, %v213_v0  ;;  %v216_v4 = vld [vmem:[%s182_s4 + $0x18] sm:$0xff]  ;;  %v217_v5 = vld [vmem:[%s182_s4 + $0x20] sm:$0xff]  ;;  %v222_v12 = vmax.f32 %v213_v0, %v214_v1  ;;  %1391 = vset.pattern.permute.xlu0 %v1510_v16  ;;  %1392 = vset.pattern.permute.xlu1 %v1510_v16  ;;  %v371_v19 = vunpack.c.l.s4 %v1511_v18  ;;  %vm209_vm0 = vcmask 253952   ;;  %s1295_s21 = sshll.u32 %s1497_s15, 4  ;;  %s203_s22 = scalar_lea.vmem [#allocation6], %s1620_s28 }
  0x2e   : > { %v218_v6 = vld [vmem:[%s182_s4 + $0x28] sm:$0xff]  ;;  %v219_v8 = vld [vmem:[%s182_s4 + $0x30] sm:$0xff]  ;;  %v220_v9 = vld [vmem:[%s182_s4 + $0x38] sm:$0xff]  ;;  %v624_v10 = vadd.f32 %v216_v4, %v215_v2  ;;  %v225_v13 = vmax.f32 %v215_v2, %v216_v4  ;;  %v1629_v20 = vshrl.u32 %v238_v17, 7  ;;  %vm1514_vm1 = vmmov 0   ;;  %s1205_s23 = sshll.u32 %s203_s22, 4  ;;  %s1810_s4 = scalar_lea.hbm %s1856_s3, %s1295_s21  ;;  %s1206_s23 = int_to_ptr.vmem [resolvable:$true] %s1205_s23 }
  0x2f   : > { %v627_v7 = vadd.f32 %v218_v6, %v217_v5  ;;  %622 = vadd.xlane.f32.xlu0 %v621_v3  ;;  %v630_v11 = vadd.f32 %v220_v9, %v219_v8  ;;  %v228_v14 = vmax.f32 %v217_v5, %v218_v6  ;;  %v231_v15 = vmax.f32 %v219_v8, %v220_v9  ;;  %s1193_s24 = scalar_lea.sflag [#allocation5], %s1620_s28  ;;  %s1425_s5 = scalar_lea.vmem %s1206_s23, 16 }
  0x30   : > { %v372_v21 = vunpack.c.0.s8 %v371_v19  ;;  %v1632_v22 = vsub.s32 0, %v1629_v20  ;;  %v1635_v23 = vsub.s32 1, %v1629_v20  ;;  %v1638_v24 = vsub.s32 2, %v1629_v20  ;;  %p1426_p8 = scmp.ne.s32.totalorder %s1206_s23, %s1425_s5  ;;  %s1515_s6 = smov [#allocation6]  }
  0x31   : > { %628 = vadd.xlane.f32.xlu1 %v627_v7  ;;  %v1641_v25 = vsub.s32 3, %v1629_v20  ;;  %v1644_v26 = vsub.s32 4, %v1629_v20  ;;  %v1647_v27 = vsub.s32 5, %v1629_v20  ;;  %v1650_v28 = vsub.s32 6, %v1629_v20  ;;  %s1429_s7 = sshll.u32 %s1515_s6, 4  ;;  %s1430_s7 = int_to_ptr.vmem [resolvable:$false] %s1429_s7 }
  0x32   : > { %v1653_v29 = vsub.s32 7, %v1629_v20  ;;  %v1656_v31 = vsub.s32 %v372_v21, %v1629_v20  ;;  %vm585_vm2 = vcmask 130112   ;;  %vm592_vm3 = vcmask 195712   ;;  %p1427_p12 = pnand %p1426_p8, %p1587_p9  ;;  %s1431_s15 = scalar_lea.vmem %s1430_s7, 32 }
  0x33   : > { %625 = vadd.xlane.f32.xlu0 %v624_v10  ;;  %vm599_vm4 = vcmask 261312   ;;  %vm1021_vm5 = vcmask 1040384   ;;  %vm1027_vm6 = vcmask 261120   ;;  %vm1107_vm7 = vcmask 1043456   ;;  %p1432_p1 = scmp.lt.s32.totalorder %s1206_s23, %s1430_s7  ;;  %p1433_p3 = scmp.lt.s32.totalorder %s1431_s15, %s1425_s5 }
  0x34   : > { %vm1103_vm8 = vcmask 31744   ;;  %p1428_p0 = pneg %p1427_p12 }
  0x35   : > { %631 = vadd.xlane.f32.xlu1 %v630_v11  ;;  %p1434_p5 = por %p1433_p3, %p1432_p1 }
  0x37   : > { %223 = vmax.xlane.f32.xlu0 %v222_v12  ;;  %p1435_p6 = pnand %p1434_p5, %p1428_p0 }
  0x39   : > { %226 = vmax.xlane.f32.xlu1 %v225_v13 }
  0x3b   : > { %229 = vmax.xlane.f32.xlu0 %v228_v14 }
  0x3d   : > { %232 = vmax.xlane.f32.xlu1 %v231_v15 }
  0xb8   : > { %v623_v30 = vpop.xlane.xlu0 %622 }
  0xb9   : > { %v640_v33 = vrot.slane %v623_v30, %v1632_v22  ;;  %v644_v34 = vrot.slane %v623_v30, %v1635_v23  ;;  %v648_v35 = vrot.slane %v623_v30, %v1638_v24  ;;  %v652_v36 = vrot.slane %v623_v30, %v1641_v25 }
  0xba   : > { %v629_v32 = vpop.xlane.xlu1 %628  ;;  %v656_v37 = vrot.slane %v623_v30, %v1644_v26  ;;  %v660_v38 = vrot.slane %v623_v30, %v1647_v27  ;;  %v664_v39 = vrot.slane %v623_v30, %v1650_v28  ;;  %v668_v40 = vrot.slane %v623_v30, %v1653_v29 }
  0xbb   : > { %v765_v41 = vcombine.low %v640_v33, %v644_v34  ;;  %v766_v42 = vcombine.low %v648_v35, %v652_v36  ;;  %v704_v43 = vrot.slane %v629_v32, %v1632_v22  ;;  %v708_v44 = vrot.slane %v629_v32, %v1635_v23 }
  0xbc   : > { %v626_v45 = vpop.xlane.xlu0 %625  ;;  %v767_v46 = vcombine.low %v656_v37, %v660_v38  ;;  %v768_v47 = vcombine.low %v664_v39, %v668_v40  ;;  %v712_v48 = vrot.slane %v629_v32, %v1638_v24  ;;  %v716_v49 = vrot.slane %v629_v32, %v1641_v25 }
  0xbd   : > { %v775_v50 = vrot.slane %v765_v41, %v1656_v31  ;;  %v782_v51 = vrot.slane %v766_v42, %v1656_v31  ;;  %v672_v52 = vrot.slane %v626_v45, %v1632_v22  ;;  %v676_v53 = vrot.slane %v626_v45, %v1635_v23 }
  0xbe   : > { %v789_v54 = vrot.slane %v767_v46, %v1656_v31  ;;  %v796_v55 = vrot.slane %v768_v47, %v1656_v31  ;;  %v680_v56 = vrot.slane %v626_v45, %v1638_v24  ;;  %v684_v57 = vrot.slane %v626_v45, %v1641_v25  ;;  %v632_v6 = vpop.xlane.xlu1 %631 }
  0xbf   : > { %v797_v58 = vcombine.low %v775_v50, %v782_v51  ;;  %v688_v59 = vrot.slane %v626_v45, %v1644_v26  ;;  %v692_v60 = vrot.slane %v626_v45, %v1647_v27  ;;  %v696_v61 = vrot.slane %v626_v45, %v1650_v28 }
  0xc0   : > { %v798_v62 = vcombine.low %v789_v54, %v796_v55  ;;  %v700_v63 = vrot.slane %v626_v45, %v1653_v29  ;;  %v814_v0 = vcombine.low %v672_v52, %v676_v53  ;;  %v815_v1 = vcombine.low %v680_v56, %v684_v57  ;;  %v224_v42 = vpop.xlane.xlu0 %223 }
  0xc1   : > { %v805_v2 = vrot.slane %v797_v58, %v1656_v31  ;;  %v816_v3 = vcombine.low %v688_v59, %v692_v60  ;;  %v720_v4 = vrot.slane %v629_v32, %v1644_v26  ;;  %v724_v5 = vrot.slane %v629_v32, %v1647_v27 }
  0xc2   : > { %v812_v7 = vrot.slane %v798_v62, %v1656_v31  ;;  %v817_v8 = vcombine.low %v696_v61, %v700_v63  ;;  %v824_v9 = vrot.slane %v814_v0, %v1656_v31  ;;  %v831_v10 = vrot.slane %v815_v1, %v1656_v31  ;;  %v227_v59 = vpop.xlane.xlu1 %226 }
  0xc3   : > { %v838_v11 = vrot.slane %v816_v3, %v1656_v31  ;;  %v728_v12 = vrot.slane %v629_v32, %v1650_v28  ;;  %v732_v13 = vrot.slane %v629_v32, %v1653_v29  ;;  %v863_v14 = vcombine.low %v704_v43, %v708_v44 }
  0xc4   : > { %v813_v15 = vcombine.low %v805_v2, %v812_v7  ;;  %v845_v16 = vrot.slane %v817_v8, %v1656_v31  ;;  %v846_v18 = vcombine.low %v824_v9, %v831_v10  ;;  %v864_v19 = vcombine.low %v712_v48, %v716_v49 }
  0xc5   : > { %v865_v21 = vcombine.low %v720_v4, %v724_v5  ;;  %v866_v30 = vcombine.low %v728_v12, %v732_v13  ;;  %v873_v33 = vrot.slane %v863_v14, %v1656_v31  ;;  %v736_v34 = vrot.slane %v632_v6, %v1632_v22 }
  0xc6   : > { %962 = vperm.xlu0 %1391, %v813_v15   ;;  %v847_v35 = vcombine.low %v838_v11, %v845_v16  ;;  %v854_v36 = vrot.slane %v846_v18, %v1656_v31  ;;  %v880_v37 = vrot.slane %v864_v19, %v1656_v31  ;;  %v740_v32 = vrot.slane %v632_v6, %v1635_v23 }
  0xc7   : > { %v887_v38 = vrot.slane %v865_v21, %v1656_v31  ;;  %v894_v39 = vrot.slane %v866_v30, %v1656_v31  ;;  %v744_v40 = vrot.slane %v632_v6, %v1638_v24  ;;  %v748_v41 = vrot.slane %v632_v6, %v1641_v25  ;;  %v230_v30 = vpop.xlane.xlu0 %229 }
  0xc8   : > { %v861_v43 = vrot.slane %v847_v35, %v1656_v31  ;;  %v895_v44 = vcombine.low %v873_v33, %v880_v37  ;;  %v752_v45 = vrot.slane %v632_v6, %v1644_v26  ;;  %v756_v46 = vrot.slane %v632_v6, %v1647_v27 }
  0xc9   : > { %v896_v47 = vcombine.low %v887_v38, %v894_v39  ;;  %v760_v48 = vrot.slane %v632_v6, %v1650_v28  ;;  %v764_v49 = vrot.slane %v632_v6, %v1653_v29  ;;  %v912_v50 = vcombine.low %v736_v34, %v740_v32 }
  0xca   : > { %v862_v51 = vcombine.low %v854_v36, %v861_v43  ;;  %v903_v52 = vrot.slane %v895_v44, %v1656_v31  ;;  %v913_v53 = vcombine.low %v744_v40, %v748_v41  ;;  %v914_v54 = vcombine.low %v752_v45, %v756_v46 }
  0xcb   : > { %v910_v55 = vrot.slane %v896_v47, %v1656_v31  ;;  %v915_v56 = vcombine.low %v760_v48, %v764_v49  ;;  %v922_v57 = vrot.slane %v912_v50, %v1656_v31  ;;  %v241_v58 = vrot.slane %v224_v42, %v1632_v22 }
  0xcc   : > { %965 = vperm.xlu1 %1392, %v862_v51   ;;  %v929_v60 = vrot.slane %v913_v53, %v1656_v31  ;;  %v936_v61 = vrot.slane %v914_v54, %v1656_v31  ;;  %v245_v62 = vrot.slane %v224_v42, %v1635_v23  ;;  %v249_v63 = vrot.slane %v224_v42, %v1638_v24 }
  0xcd   : > { %v911_v0 = vcombine.low %v903_v52, %v910_v55  ;;  %v943_v1 = vrot.slane %v915_v56, %v1656_v31  ;;  %v253_v2 = vrot.slane %v224_v42, %v1641_v25  ;;  %v257_v3 = vrot.slane %v224_v42, %v1644_v26  ;;  %v233_v52 = vpop.xlane.xlu1 %232 }
  0xce   : > { %v944_v4 = vcombine.low %v922_v57, %v929_v60  ;;  %v261_v5 = vrot.slane %v224_v42, %v1647_v27  ;;  %v265_v6 = vrot.slane %v224_v42, %v1650_v28  ;;  %v269_v7 = vrot.slane %v224_v42, %v1653_v29 }
  0xcf   : > { %v945_v8 = vcombine.low %v936_v61, %v943_v1  ;;  %v366_v9 = vcombine.low %v241_v58, %v245_v62  ;;  %v367_v10 = vcombine.low %v249_v63, %v253_v2  ;;  %v273_v11 = vrot.slane %v227_v59, %v1632_v22 }
  0xd0   : > { %968 = vperm.xlu1 %1392, %v911_v0   ;;  %v952_v12 = vrot.slane %v944_v4, %v1656_v31  ;;  %v368_v13 = vcombine.low %v257_v3, %v261_v5  ;;  %v369_v14 = vcombine.low %v265_v6, %v269_v7  ;;  %v277_v15 = vrot.slane %v227_v59, %v1635_v23 }
  0xd1   : > { %v959_v16 = vrot.slane %v945_v8, %v1656_v31  ;;  %v376_v18 = vrot.slane %v366_v9, %v1656_v31  ;;  %v383_v19 = vrot.slane %v367_v10, %v1656_v31  ;;  %v281_v21 = vrot.slane %v227_v59, %v1638_v24 }
  0xd2   : > { %v390_v33 = vrot.slane %v368_v13, %v1656_v31  ;;  %v397_v34 = vrot.slane %v369_v14, %v1656_v31  ;;  %v285_v35 = vrot.slane %v227_v59, %v1641_v25  ;;  %v289_v36 = vrot.slane %v227_v59, %v1644_v26 }
  0xd3   : > { %v960_v37 = vcombine.low %v952_v12, %v959_v16  ;;  %v398_v32 = vcombine.low %v376_v18, %v383_v19  ;;  %v293_v38 = vrot.slane %v227_v59, %v1647_v27  ;;  %v297_v39 = vrot.slane %v227_v59, %v1650_v28 }
  0xd4   : > { %v399_v40 = vcombine.low %v390_v33, %v397_v34  ;;  %v301_v41 = vrot.slane %v227_v59, %v1653_v29  ;;  %v415_v42 = vcombine.low %v273_v11, %v277_v15  ;;  %v416_v43 = vcombine.low %v281_v21, %v285_v35 }
  0xd5   : > { %971 = vperm.xlu1 %1392, %v960_v37   ;;  %v406_v44 = vrot.slane %v398_v32, %v1656_v31  ;;  %v417_v45 = vcombine.low %v289_v36, %v293_v38  ;;  %v305_v46 = vrot.slane %v230_v30, %v1632_v22  ;;  %v309_v47 = vrot.slane %v230_v30, %v1635_v23 }
  0xd6   : > { %v413_v48 = vrot.slane %v399_v40, %v1656_v31  ;;  %v418_v49 = vcombine.low %v297_v39, %v301_v41  ;;  %v425_v50 = vrot.slane %v415_v42, %v1656_v31  ;;  %v432_v51 = vrot.slane %v416_v43, %v1656_v31  ;;  %v1026_v43 = vld [vmem:[%s1854_s1 + $0x18] sm:$0xff] }
  0xd7   : > { %v439_v53 = vrot.slane %v417_v45, %v1656_v31  ;;  %v313_v54 = vrot.slane %v230_v30, %v1638_v24  ;;  %v317_v55 = vrot.slane %v230_v30, %v1641_v25  ;;  %v321_v56 = vrot.slane %v230_v30, %v1644_v26  ;;  %v1024_v45 = vld [vmem:[%s1854_s1 + $0x8] sm:$0xff] }
  0xd8   : > { %v414_v57 = vcombine.low %v406_v44, %v413_v48  ;;  %v446_v58 = vrot.slane %v418_v49, %v1656_v31  ;;  %v447_v59 = vcombine.low %v425_v50, %v432_v51  ;;  %v325_v60 = vrot.slane %v230_v30, %v1647_v27  ;;  %v1025_v44 = vld [vmem:[%s1854_s1 + $0x10] sm:$0xff] }
  0xd9   : > { %v329_v61 = vrot.slane %v230_v30, %v1650_v28  ;;  %v333_v62 = vrot.slane %v230_v30, %v1653_v29  ;;  %v464_v63 = vcombine.low %v305_v46, %v309_v47  ;;  %v465_v0 = vcombine.low %v313_v54, %v317_v55  ;;  %v1023_v46 = vld [vmem:[%s1854_s1] sm:$0xff] }
  0xda   : > { %563 = vperm.xlu1 %1392, %v414_v57   ;;  %v448_v1 = vcombine.low %v439_v53, %v446_v58  ;;  %v455_v2 = vrot.slane %v447_v59, %v1656_v31  ;;  %v466_v3 = vcombine.low %v321_v56, %v325_v60  ;;  %v337_v4 = vrot.slane %v233_v52, %v1632_v22 }
  0xdb   : > { %v467_v5 = vcombine.low %v329_v61, %v333_v62  ;;  %v474_v6 = vrot.slane %v464_v63, %v1656_v31  ;;  %v481_v7 = vrot.slane %v465_v0, %v1656_v31  ;;  %v341_v8 = vrot.slane %v233_v52, %v1635_v23 }
  0xdc   : > { %v462_v9 = vrot.slane %v448_v1, %v1656_v31  ;;  %v488_v10 = vrot.slane %v466_v3, %v1656_v31  ;;  %v345_v11 = vrot.slane %v233_v52, %v1638_v24  ;;  %v349_v12 = vrot.slane %v233_v52, %v1641_v25 }
  0xdd   : > { %v495_v13 = vrot.slane %v467_v5, %v1656_v31  ;;  %v496_v14 = vcombine.low %v474_v6, %v481_v7  ;;  %v353_v15 = vrot.slane %v233_v52, %v1644_v26  ;;  %v357_v16 = vrot.slane %v233_v52, %v1647_v27 }
  0xde   : > { %v463_v18 = vcombine.low %v455_v2, %v462_v9  ;;  %v361_v19 = vrot.slane %v233_v52, %v1650_v28  ;;  %v365_v23 = vrot.slane %v233_v52, %v1653_v29  ;;  %v513_v21 = vcombine.low %v337_v4, %v341_v8 }
  0xdf   : > { %v497_v30 = vcombine.low %v488_v10, %v495_v13  ;;  %v504_v33 = vrot.slane %v496_v14, %v1656_v31  ;;  %v514_v34 = vcombine.low %v345_v11, %v349_v12  ;;  %v515_v24 = vcombine.low %v353_v15, %v357_v16 }
  0xe0   : > { %566 = vperm.xlu1 %1392, %v463_v18   ;;  %v516_v25 = vcombine.low %v361_v19, %v365_v23  ;;  %v523_v35 = vrot.slane %v513_v21, %v1656_v31  ;;  %v1512_v38 = vmov 0.0   ;;  %v1513_v40 = vmov -inf  }
  0xe1   : > { %v511_v36 = vrot.slane %v497_v30, %v1656_v31  ;;  %v530_v26 = vrot.slane %v514_v34, %v1656_v31  ;;  %v537_v27 = vrot.slane %v515_v24, %v1656_v31  ;;  %212 = vst.msk [vmem:[#allocation2 + $0x1] sm:$0x1] %vm209_vm0, %v1512_v38  ;;  %1306 = vmatprep.subr.mxu0 %v1512_v38  ;;  %210 = vst.msk [vmem:[#allocation2] sm:$0x1] %vm209_vm0, %v1513_v40  ;;  %v1102_v24 = vld [vmem:[%s1855_s2] sm:$0xf] }
  0xe2   : > { %v544_v28 = vrot.slane %v516_v25, %v1656_v31  ;;  %1317 = vmatprep.subr.mxu1 %v1512_v38  ;;  %1307 = vmatpush3.msra.mxu0 %v1026_v43  ;;  %v575_v47 = vand.u32 127, %v238_v17 }
  0xe3   : > { %v512_v29 = vcombine.low %v504_v33, %v511_v36  ;;  %v545_v37 = vcombine.low %v523_v35, %v530_v26  ;;  %1314 = vmatprep.mubr.msk.f32.mxu0 %vm1514_vm1, %v1512_v38  ;;  %1308 = vmatprep.subr.mxu0 %v1512_v38 }
  0xe4   : > { %v546_v32 = vcombine.low %v537_v27, %v544_v28  ;;  %1319 = vmatprep.mubr.msk.f32.mxu1 %vm1514_vm1, %v1512_v38  ;;  %1309 = vmatpush3.msra.mxu0 %v1025_v44  ;;  %v580_v48 = vadd.s32 4294967288, %v575_v47  ;;  %v587_v49 = vadd.s32 4294967280, %v575_v47  ;;  %v594_v52 = vadd.s32 4294967272, %v575_v47 }
  0xe5   : > { %569 = vperm.xlu1 %1392, %v512_v29   ;;  %v553_v39 = vrot.slane %v545_v37, %v1656_v31  ;;  %1310 = vmatprep.subr.mxu0 %v1512_v38  ;;  %v578_v54 = vsub.s32 %v575_v47, %v1629_v20 }
  0xe6   : > { %v560_v41 = vrot.slane %v546_v32, %v1656_v31  ;;  %1311 = vmatpush3.msra.mxu0 %v1024_v45  ;;  %v583_v51 = vsub.s32 %v580_v48, %v1629_v20  ;;  %v590_v53 = vsub.s32 %v587_v49, %v1629_v20  ;;  %v597_v58 = vsub.s32 %v594_v52, %v1629_v20 }
  0xe7   : > { %1312 = vmatprep.subr.mxu0 %v1512_v38  ;;  %1318 = vmatpush3.msk.msra.mxu1 %vm1107_vm7, %v1102_v24 }
  0xe8   : > { %v561_v42 = vcombine.low %v553_v39, %v560_v41  ;;  %1313 = vmatpush3.msra.mxu0 %v1023_v46  ;;  %v620_v2 = vld [vmem:[#allocation2 + $0x1] sm:$0x1]  ;;  %v221_v16 = vld [vmem:[#allocation2] sm:$0x1] }
  0xea   : > { %572 = vperm.xlu1 %1392, %v561_v42  }
 0x141   : > { %v963_v56 = vpop.permute.xlu0 %962 }
 0x142   : > { %v976_v60 = vrot.slane %v963_v56, %v578_v54 }
 0x147   : > { %v966_v50 = vpop.permute.xlu1 %965 }
 0x148   : > { %v980_v57 = vrot.slane %v966_v50, %v583_v51 }
 0x14a   : > { %v981_v61 = vsel %vm585_vm2, %v980_v57, %v976_v60 }
 0x14b   : > { %v969_v55 = vpop.permute.xlu1 %968 }
 0x14c   : > { %v985_v59 = vrot.slane %v969_v55, %v590_v53 }
 0x14e   : > { %v986_v63 = vsel %vm592_vm3, %v985_v59, %v981_v61 }
 0x150   : > { %v972_v17 = vpop.permute.xlu1 %971 }
 0x151   : > { %v990_v62 = vrot.slane %v972_v17, %v597_v58 }
 0x153   : > { %v991_v0 = vsel %vm599_vm4, %v990_v62, %v986_v63 }
 0x154   : > { %v998_v1 = vrot.slane %v991_v0, %v1656_v31 }
 0x155   : > { %v564_v3 = vpop.permute.xlu1 %563 }
 0x156   : > { %v1005_v4 = vrot.slane %v998_v1, %v1656_v31  ;;  %v579_v9 = vrot.slane %v564_v3, %v578_v54 }
 0x158   : > { %v1007_v20 = vadd.f32 %v1005_v4, %v620_v2 }
 0x15a   : > { %1008 = vst.msk [vmem:[#allocation2 + $0x1] sm:$0x1] %vm209_vm0, %v1007_v20 }
 0x15b   : > { %v567_v5 = vpop.permute.xlu1 %566 }
 0x15c   : > { %v584_v7 = vrot.slane %v567_v5, %v583_v51 }
 0x15e   : > { %v586_v11 = vsel %vm585_vm2, %v584_v7, %v579_v9 }
 0x160   : > { %v570_v6 = vpop.permute.xlu1 %569 }
 0x161   : > { %v591_v8 = vrot.slane %v570_v6, %v590_v53  ;;  %v1013_v23 = vld [vmem:[#allocation2 + $0x1] sm:$0x1] }
 0x162   : > { %v1014_v21 = vmul.f32 0.00390625, %v1013_v23 }
 0x163   : > { %v593_v13 = vsel %vm592_vm3, %v591_v8, %v586_v11 }
 0x164   : > { %v1019_v30 = vrot.slane %v1014_v21, %v1632_v22 }
 0x165   : > { %v573_v10 = vpop.permute.xlu1 %572 }
 0x166   : > { %v598_v12 = vrot.slane %v573_v10, %v597_v58 }
 0x168   : > { %v600_v14 = vsel %vm599_vm4, %v598_v12, %v593_v13 }
 0x169   : > { %v607_v15 = vrot.slane %v600_v14, %v1656_v31 }
 0x16b   : > { %v614_v18 = vrot.slane %v607_v15, %v1656_v31 }
 0x16d   : > { %v616_v19 = vmax.f32 %v221_v16, %v614_v18 }
 0x16f   : > { %618 = vst.msk [vmem:[#allocation2] sm:$0x1] %vm209_vm0, %v616_v19 }
 0x176   : > { %v1012_v33 = vld [vmem:[#allocation2] sm:$0x1] }
 0x177   : > { %v1022_v34 = vsel %vm1021_vm5, %v1012_v33, %v1019_v30 }
 0x178   : > { %1315 = vmatmul.mubr.msk.f32.vlgmr.msra.gmra.mxu0 %vm1027_vm6, %v1022_v34 }
 0x238   : > { %v1097_v31 = vpop.f32.mrf.mxu0 }
 0x239   : > { %v1101_v25 = vmax.f32 %v1097_v31, 0.0 }
 0x23a   : > { %v1316_v35 = vpop.f32.mrf.mxu0 }
 0x23b   : > { %1320 = vmatmul.mubr.msk.f32.vlgmr.msra.gmra.mxu1 %vm1103_vm8, %v1101_v25 }
 0x2fb   : > { %v1177_v36 = vpop.f32.mrf.mxu1 }
 0x2fc   : > { %v1182_v22 = vrot.slane %v1177_v36, 1 }
 0x2fd   : > { %v1321_v26 = vpop.f32.mrf.mxu1 }
 0x2fe   : > { %v1184_v27 = vadd.f32 %v1182_v22, %v1177_v36 }
 0x300   : > { %v1294_v28 = vmul.f32 -1.442695, %v1184_v27 }
 0x302   : > { %1393 = vpow2.f32 %v1294_v28 }
 0x30f   : > { %v1394_v29 = vpop.eup %1393 }
 0x310   : > { %v1188_v37 = vadd.f32 1.0, %v1394_v29 }
 0x312   : > { %1395 = vrcp.f32 %v1188_v37 }
 0x31f   : > { %v1396_v32 = vpop.eup %1395 }
 0x320   : > { %1191 = vst.msk [vmem:[%s203_s22] sm:$0x1] %vm209_vm0, %v1396_v32 }
 0x321   : > { %1438 = shalt.err (!%p1435_p6)
}
 0x322   : > { %s1439_s8 = scalar_lea.hbm %s1810_s4, 16  ;;  %s1443_s10 = scalar_lea.hbm %s1856_s3, 32 }
 0x323   : > { %p1440_p7 = scmp.ne.s32.totalorder %s1810_s4, %s1439_s8  ;;  %p1444_p13 = scmp.lt.s32.totalorder %s1810_s4, %s1856_s3 }
 0x324   : > { %p1445_p2 = scmp.lt.s32.totalorder %s1443_s10, %s1439_s8 }
 0x325   : > { %p1441_p10 = pnand %p1440_p7, %p1587_p9 }
 0x326   : > { %p1446_p8 = por %p1445_p2, %p1444_p13 }
 0x327   : > { %p1442_p4 = pneg %p1441_p10 }
 0x329   : > { %p1447_p12 = pnand %p1446_p8, %p1442_p4 }
 0x32b   : > { %1450 = shalt.err (!%p1447_p12)
}
 0x32c   : > { %1324 = dma.vmem_to_hbm [thread:$0]  (%p1587_p9), %s1206_s23, 16, %s1810_s4, %s1193_s24  }
 0x32d PF: > { %s1217_s19 = sand.u32 1, %s1485_s12   ;;  %p1862_p0 = scmp.ge.s32.totalorder %s1505_s17, 2 }
 0x32e   : > { %s1218_s21 = scalar_lea.sflag [#allocation5], %s1217_s19 }
 0x32f   : > { %p1331_p1 = pnand %p1862_p0, %p1594_p11 }
 0x331   : > { %p1332_p3 = pneg %p1331_p1 }
 0x333   : > { %1480 = dma.done.wait (%p1332_p3), %s1218_s21, 16  }
 0x334   : > { %1482 = vsyncadd (%p1332_p3), %s1218_s21, 4294967280  ;;  %s19_s17 = sadd.s32 1, %s1505_s17   ;;  %s1863_s12 = smov %s1489_s13 }
 0x335   : > { %p16_p5 = scmp.ge.s32.totalorder %s19_s17, 4   ;;  %s1864_s13 = smov %s1493_s14 }
 0x336   : > { %s1865_s14 = smov %s1592_s26  ;;  %s1866_s15 = smov %s1501_s16 }
 0x337   : > { %s1867_s16 = smov %s1869_s20  ;;  %18 = sbr.rel (!%p16_p5) target bundleno = 6 (0x6), region = 87 }
 0x33c   :  { %1222 = vsyncpa [#allocation4], 1 }
 0x33d   :  { %1224 = vsyncpa [#allocation4 + $0x1], 1 }
 0x33e   :  { %1225 = vsyncpa [#allocation5], 1 }
 0x33f   :  { %1227 = vsyncpa [#allocation5 + $0x1], 1 }

</bundles_post_ra>
